<compile_context>
chip_gen: v7x
topology: tpu7x:2x2x1
jax: 0.10.0
libtpu: 0.0.40
codegen_flags: <defaults>
</compile_context>

<pallas_src>
import functools

import jax
import jax.numpy as jnp
from jax import lax
from jax.experimental import pallas as pl
from jax.experimental.pallas import tpu as pltpu

BN_EPS = 1e-5
NEG_INF = -1e30          # finite "minus infinity": online-softmax rescale never NaNs

MAX_TILE_DST = 32        # dst rows per grid step == bits per packed adjacency word
MAX_TILE_SRC = 256       # src cols per grid step (lane multiple of 128)


def _round_up(n, m):
    return ((n + m - 1) // m) * m


def _bf16_scores_ok():
    """bf16 exp on the EUP only pays off on v6e/v7x (v5e would emulate it)."""
    try:
        kind = jax.devices()[0].device_kind.lower()
    except Exception:
        return False
    return ("v6" in kind) or ("v7" in kind)


# ----------------------------------------------------------------------------
# Prologue kernel: per-layer src projection, hoisted out of the (dst, src) grid
# ----------------------------------------------------------------------------
def src_proj_kernel(x_ref, w_ref, asrc_ref, adst_ref, xl_ref, ast_ref, adst_out_ref):
    f32 = jnp.float32
    xl = jnp.dot(x_ref[...], w_ref[...], preferred_element_type=f32)       # [Ts, H*C]
    xl_bf = xl.astype(jnp.bfloat16)
    xl_ref[...] = xl_bf
    # alpha_src produced already transposed as [H, Ts] (lane-dense over src), so the
    # attention kernel slices per-head rows with no in-loop transpose.
    ast_ref[...] = lax.dot_general(asrc_ref[...], xl_bf, (((0,), (1,)), ((), ())),
                                   preferred_element_type=f32)             # [H, Ts]
    # alpha_dst for every sampled node (dst nodes are a prefix of the src node set).
    adst_out_ref[...] = jnp.dot(xl_bf, adst_ref[...], preferred_element_type=f32)  # [Ts,H]


# ----------------------------------------------------------------------------
# Attention kernel: grid = (dst tile i [parallel], src tile k [online-softmax reduction])
# ----------------------------------------------------------------------------
def gat_attn_kernel(xl_ref, ast_ref, adst_ref, xdst_ref, adj_ref, bitsel_ref,
                    expand_ref, w_skip_ref, scale_ref, shift_ref, out_ref,
                    m_s, l_s, acc_s, num_s, *, heads, out_ch, is_final, score_bf16):
    k = pl.program_id(1)
    f32 = jnp.float32
    bf16 = jnp.bfloat16
    tile_dst = out_ref.shape[0]
    tile_src = xl_ref.shape[0]

    @pl.when(k == 0)
    def _init():
        m_s[...] = jnp.full_like(m_s, NEG_INF)
        l_s[...] = jnp.zeros_like(l_s)
        acc_s[...] = jnp.zeros_like(acc_s)

    xl_bf = xl_ref[...]                                      # [Ts, H*C] bf16 (precomputed)
    ast = ast_ref[...]                                       # [H, Ts]   f32
    adst = adst_ref[...]                                     # [Td, H]   f32

    # Unpack bit-packed adjacency: word bit r <-> dst row r of this tile. One additive
    # mask bias shared by all heads (hoisted out of the head loop).
    words = jnp.broadcast_to(adj_ref[0], (tile_dst, tile_src))             # [Td, Ts] i32
    edge = (words & bitsel_ref[...]) != 0                                  # [Td, Ts]
    edge_bias = jnp.where(edge, 0.0, NEG_INF).astype(f32)

    m_prev = m_s[...]                                        # [Td, H] before this tile
    for h in range(heads):                                   # static unroll (H is small)
        c0 = h * out_ch
        s = adst[:, h:h + 1] + ast[h:h + 1, :]                             # [Td, Ts]
        e = jnp.maximum(s, 0.2 * s) + edge_bias               # LeakyReLU, then mask bias
        m_old = m_prev[:, h:h + 1]
        m_new = jnp.maximum(m_old, jnp.max(e, axis=-1, keepdims=True))     # [Td, 1]
        if score_bf16:
            # v6e/v7x: bf16 exp halves EUP pushes; p feeds the MXU in bf16 anyway.
            p = jnp.exp((e - m_new).astype(bf16))
            l_h = jnp.sum(p, axis=-1, keepdims=True, dtype=f32)
            num_h = jnp.dot(p, xl_bf[:, c0:c0 + out_ch], preferred_element_type=f32)
        else:
            p = jnp.exp(e - m_new)                  # masked entries underflow to exact 0
            l_h = jnp.sum(p, axis=-1, keepdims=True)
            num_h = jnp.dot(p.astype(bf16), xl_bf[:, c0:c0 + out_ch],
                            preferred_element_type=f32)
        corr_h = jnp.exp(m_old - m_new)
        l_s[:, h:h + 1] = corr_h * l_s[:, h:h + 1] + l_h      # running stats stay f32
        num_s[:, c0:c0 + out_ch] = num_h                      # full-width temp (no RMW)
        m_s[:, h:h + 1] = m_new

    # Single lane-dense accumulator update: widen corr [Td,H] -> [Td,H*C] via the
    # one-hot head->lane expand matrix (tiny MXU matmul), one full-width RMW on acc_s.
    corr_full = jnp.dot(jnp.exp(m_prev - m_s[...]), expand_ref[...],
                        preferred_element_type=f32)                        # [Td, H*C]
    acc_s[...] = corr_full * acc_s[...] + num_s[...]

    @pl.when(k == pl.num_programs(1) - 1)
    def _finalize():
        # Every real dst row has >= 1 edge (self-loop invariant), so l > 0; padded rows
        # give finite garbage and are sliced off by the wrapper.
        skip = jnp.dot(xdst_ref[...], w_skip_ref[...], preferred_element_type=f32)
        if is_final:
            inv_l = 1.0 / l_s[...]          # exact divide: this feeds log_softmax
            conv = acc_s[:, 0:out_ch] * inv_l[:, 0:1]
            for h in range(1, heads):
                c0 = h * out_ch
                conv = conv + acc_s[:, c0:c0 + out_ch] * inv_l[:, h:h + 1]
            y = conv * (1.0 / heads) + skip + shift_ref[...]
            mx = jnp.max(y, axis=-1, keepdims=True)
            z = y - mx
            out_ref[...] = (z - jnp.log(jnp.sum(jnp.exp(z), axis=-1, keepdims=True))
                            ).astype(out_ref.dtype)
        else:
            inv_l = pl.reciprocal(l_s[...], approx=True)                   # [Td, H]
            inv_full = jnp.dot(inv_l, expand_ref[...], preferred_element_type=f32)
            y = acc_s[...] * inv_full + skip                  # full-lane-width normalize
            y = y * scale_ref[...] + shift_ref[...]           # folded bias + eval-BN
            y = jnp.where(y > 0, y, jnp.expm1(y))             # ELU(alpha=1)
            out_ref[...] = y.astype(out_ref.dtype)


# ----------------------------------------------------------------------------
# Wrapper: frontier-sized tiles, bit-packed adjacency, prologue + attention calls
# ----------------------------------------------------------------------------
def _weight_spec(shape, ndim=2):
    if ndim == 1:
        return pl.BlockSpec(shape, lambda k: tuple(0 for _ in shape))
    return pl.BlockSpec(shape, lambda i, k: tuple(0 for _ in shape))


def _vmem_limit_bytes(tile_dst, tile_src, fin, hc, out_dim, heads):
    stream = 2 * (tile_src * hc * 2 + heads * tile_src * 4 + tile_dst * heads * 4
                  + tile_dst * fin * 2 + tile_src * 4 + tile_dst * out_dim * 4)
    resident = fin * out_dim * 2 + heads * hc * 4 + 2 * out_dim * 4 + tile_dst * 4
    scratch = tile_dst * (2 * heads + 2 * hc) * 4
    temps = (4 * heads + 8) * tile_dst * tile_src * 4
    est = 2 * (stream + resident + scratch + temps)
    # Clamp well below v7x's 64 MiB physical VMEM (review: keep the scoped request low).
    return int(min(max(est, 16 << 20), 32 << 20))


def gat_layer(x, adj, p, heads, out_ch, is_final, score_bf16):
    nd, ns = adj.shape
    fin = x.shape[1]
    hc = heads * out_ch
    out_dim = out_ch if is_final else hc
    bf16 = jnp.bfloat16

    # Tiles sized to the actual frontier (dst multiple of 8, src multiple of 128).
    tile_dst = min(MAX_TILE_DST, _round_up(nd, 8))
    if nd > 8 and _round_up(nd, tile_dst) // tile_dst < 2:
        # Guarantee >= 2 dst tiles so the "parallel" axis can shard across v7x's 2 TCs.
        tile_dst = _round_up((nd + 1) // 2, 8)
    tile_src = min(MAX_TILE_SRC, _round_up(ns, 128))
    nd_p = _round_up(nd, tile_dst)
    ns_p = _round_up(ns, tile_src)
    n_dst_tiles = nd_p // tile_dst
    n_src_tiles = ns_p // tile_src

    x_p = jnp.pad(x.astype(bf16), ((0, ns_p - ns), (0, 0)))

    # Bit-pack adjacency along dst: one int32 word holds the tile_dst dst-row bits of
    # one src column (up to 8x fewer HBM bytes than an int8 mask).
    adj_pad = jnp.pad(adj > 0, ((0, nd_p - nd), (0, ns_p - ns)))
    bit_w = jnp.left_shift(jnp.uint32(1), jnp.arange(tile_dst, dtype=jnp.uint32))
    packed = jnp.sum(adj_pad.astype(jnp.uint32).reshape(n_dst_tiles, tile_dst, ns_p)
                     * bit_w[None, :, None], axis=1, dtype=jnp.uint32)
    adj_packed = lax.bitcast_convert_type(packed, jnp.int32).reshape(n_dst_tiles, 1, ns_p)
    bitsel = lax.bitcast_convert_type(bit_w, jnp.int32).reshape(tile_dst, 1)

    # ---- prologue: project src nodes once (xl, alpha_src^T, alpha_dst) ----------------
    xl, ast, adst = pl.pallas_call(
        src_proj_kernel,
        out_shape=(jax.ShapeDtypeStruct((ns_p, hc), bf16),
                   jax.ShapeDtypeStruct((heads, ns_p), jnp.float32),
                   jax.ShapeDtypeStruct((ns_p, heads), jnp.float32)),
        grid_spec=pltpu.PrefetchScalarGridSpec(
            num_scalar_prefetch=0,
            grid=(n_src_tiles,),
            in_specs=[
                pl.BlockSpec((tile_src, fin), lambda k: (k, 0)),     # x tile (bf16)
                _weight_spec((fin, hc), ndim=1),                     # W           bf16
                _weight_spec((hc, heads), ndim=1),                   # att_src mat bf16
                _weight_spec((hc, heads), ndim=1),                   # att_dst mat bf16
            ],
            out_specs=[
                pl.BlockSpec((tile_src, hc), lambda k: (k, 0)),      # xl
                pl.BlockSpec((heads, tile_src), lambda k: (0, k)),   # alpha_src^T
                pl.BlockSpec((tile_src, heads), lambda k: (k, 0)),   # alpha_dst
            ]),
        compiler_params=pltpu.CompilerParams(dimension_semantics=("parallel",)),
    )(x_p, p["w"], p["a_src"], p["a_dst"])

    # ---- attention / aggregation over the (dst, src) grid -----------------------------
    kernel = functools.partial(gat_attn_kernel, heads=heads, out_ch=out_ch,
                               is_final=is_final, score_bf16=score_bf16)
    out = pl.pallas_call(
        kernel,
        out_shape=jax.ShapeDtypeStruct((nd_p, out_dim),
                                       jnp.float32 if is_final else bf16),
        grid_spec=pltpu.PrefetchScalarGridSpec(
            num_scalar_prefetch=0,
            grid=(n_dst_tiles, n_src_tiles),
            in_specs=[
                pl.BlockSpec((tile_src, hc), lambda i, k: (k, 0)),       # xl tile
                pl.BlockSpec((heads, tile_src), lambda i, k: (0, k)),    # alpha_src^T
                pl.BlockSpec((tile_dst, heads), lambda i, k: (i, 0)),    # alpha_dst
                pl.BlockSpec((tile_dst, fin), lambda i, k: (i, 0)),      # x_dst (skip)
                pl.BlockSpec((1, 1, tile_src), lambda i, k: (i, 0, k)),  # packed adj
                pl.BlockSpec((tile_dst, 1), lambda i, k: (0, 0)),        # per-row bit
                pl.BlockSpec((heads, hc), lambda i, k: (0, 0)),          # head expand
                pl.BlockSpec((fin, out_dim), lambda i, k: (0, 0)),       # W_skip  bf16
                pl.BlockSpec((1, out_dim), lambda i, k: (0, 0)),         # BN scale
                pl.BlockSpec((1, out_dim), lambda i, k: (0, 0)),         # bias/shift
            ],
            out_specs=pl.BlockSpec((tile_dst, out_dim), lambda i, k: (i, 0)),
            scratch_shapes=[
                pltpu.VMEM((tile_dst, heads), jnp.float32),   # running max m
                pltpu.VMEM((tile_dst, heads), jnp.float32),   # running sum l
                pltpu.VMEM((tile_dst, hc), jnp.float32),      # weighted-sum accumulator
                pltpu.VMEM((tile_dst, hc), jnp.float32),      # per-step numerator temp
            ]),
        compiler_params=pltpu.CompilerParams(
            dimension_semantics=("parallel", "arbitrary"),
            vmem_limit_bytes=_vmem_limit_bytes(tile_dst, tile_src, fin, hc,
                                               out_dim, heads)),
    )(xl, ast, adst, x_p, adj_packed, bitsel,
      p["expand"], p["w_skip"], p["scale"], p["shift"])
    return out[:nd]


def gat_forward(x, adjs, params, heads, hidden, num_classes):
    score_bf16 = _bf16_scores_ok()
    num_layers = len(adjs)
    for i, adj in enumerate(adjs):
        is_final = (i == num_layers - 1)
        out_ch = num_classes if is_final else hidden
        x = gat_layer(x, adj, params[i], heads, out_ch, is_final, score_bf16)
    return x


# ----------------------------------------------------------------------------
# Parameter construction + host-side folding (shapes follow GAT.__init__)
# ----------------------------------------------------------------------------
def make_att_matrix(att):
    """att: [H, C] -> block-diag [H*C, H] so x_lin @ M == (x_lin.view(-1,H,C)*att).sum(-1)."""
    h, c = att.shape
    eye = jnp.eye(h, dtype=att.dtype)
    return (att[:, :, None] * eye[:, None, :]).reshape(h * c, h)


def prepare_layer_params(raw, is_final):
    """Fold conv/skip biases and eval-mode BatchNorm into one affine; cast matmul
    operands (W, W_skip, attention matrices) to bf16; build the head->lane expand."""
    bias = raw["conv_b"] + raw["b_skip"]
    if is_final:
        scale = jnp.ones_like(bias)
        shift = bias
    else:
        s = raw["bn_gamma"] * lax.rsqrt(raw["bn_var"] + BN_EPS)
        scale = s
        shift = raw["bn_beta"] - raw["bn_mean"] * s + bias * s
    heads, out_ch = raw["att_src"].shape
    expand = jnp.kron(jnp.eye(heads, dtype=jnp.float32),
                      jnp.ones((1, out_ch), jnp.float32))         # [H, H*C] one-hot
    return {
        "w": raw["w"].astype(jnp.bfloat16),
        "a_src": make_att_matrix(raw["att_src"]).astype(jnp.bfloat16),
        "a_dst": make_att_matrix(raw["att_dst"]).astype(jnp.bfloat16),
        "w_skip": raw["w_skip"].astype(jnp.bfloat16),
        "scale": scale.astype(jnp.float32),
        "shift": shift.astype(jnp.float32),
        "expand": expand,
    }


def init_params(key, num_features, hidden, heads, num_classes):
    hc_hidden = heads * hidden
    specs = [(num_features, hidden, False), (hc_hidden, hidden, False),
             (hc_hidden, num_classes, True)]
    params = []
    for li, (fin, cout, is_final) in enumerate(specs):
        ks = jax.random.split(jax.random.fold_in(key, li), 10)
        out_dim = cout if is_final else heads * cout
        raw = {
            "w": 0.2 * jax.random.normal(ks[0], (fin, heads * cout), jnp.float32),
            "att_src": 0.2 * jax.random.normal(ks[1], (heads, cout), jnp.float32),
            "att_dst": 0.2 * jax.random.normal(ks[2], (heads, cout), jnp.float32),
            "conv_b": 0.1 * jax.random.normal(ks[3], (1, out_dim), jnp.float32),
            "w_skip": 0.2 * jax.random.normal(ks[4], (fin, out_dim), jnp.float32),
            "b_skip": 0.1 * jax.random.normal(ks[5], (1, out_dim), jnp.float32),
        }
        if not is_final:   # hidden layers have BatchNorm1d(heads * hidden_channels)
            raw["bn_gamma"] = 1.0 + 0.1 * jax.random.normal(ks[6], (1, out_dim), jnp.float32)
            raw["bn_beta"] = 0.1 * jax.random.normal(ks[7], (1, out_dim), jnp.float32)
            raw["bn_mean"] = 0.1 * jax.random.normal(ks[8], (1, out_dim), jnp.float32)
            raw["bn_var"] = 1.0 + 0.1 * jnp.abs(
                jax.random.normal(ks[9], (1, out_dim), jnp.float32))
        params.append(prepare_layer_params(raw, is_final))
    return params


if __name__ == "__main__":
    NUM_FEATURES, HIDDEN, HEADS, NUM_CLASSES = 32, 8, 4, 8
    N = [64, 32, 16, 8]   # sampled-subgraph node counts per hop (src of layer l = N[l])

    key = jax.random.PRNGKey(0)
    kx, kp, ka0, ka1, ka2 = jax.random.split(key, 5)

    x = jax.random.normal(kx, (N[0], NUM_FEATURES), jnp.float32)

    adjs = []
    for l, kadj in enumerate((ka0, ka1, ka2)):
        a = jax.random.bernoulli(kadj, 0.3, (N[l + 1], N[l])).astype(jnp.float32)
        # GATConv(add_self_loops=True): ensure a self-loop for every target node
        a = a.at[jnp.arange(N[l + 1]), jnp.arange(N[l + 1])].set(1.0)
        adjs.append(a)

    params = init_params(kp, NUM_FEATURES, HIDDEN, HEADS, NUM_CLASSES)

    out = gat_forward(x, adjs, params, HEADS, HIDDEN, NUM_CLASSES)
    out = jax.block_until_ready(out)

    assert out.shape == (N[-1], NUM_CLASSES), out.shape
    assert bool(jnp.all(jnp.isfinite(out)))
    # rows of log_softmax must exp-sum to 1
    assert bool(jnp.allclose(jnp.sum(jnp.exp(out), axis=-1), 1.0, atol=1e-4))
    print("KERNEL_OK")
</pallas_src>

<mosaic_0001>
module attributes {stable_mosaic.version = 11 : i64} {
  func.func @src_proj_kernel(%arg0: i32, %arg1: memref<128x32xbf16, #tpu.memory_space<vmem>>, %arg2: memref<32x32xbf16, #tpu.memory_space<vmem>>, %arg3: memref<32x4xbf16, #tpu.memory_space<vmem>>, %arg4: memref<32x4xbf16, #tpu.memory_space<vmem>>, %arg5: memref<128x32xbf16, #tpu.memory_space<vmem>>, %arg6: memref<4x128xf32, #tpu.memory_space<vmem>>, %arg7: memref<128x4xf32, #tpu.memory_space<vmem>>) attributes {dimension_semantics = [#tpu.dimension_semantics<parallel>], iteration_bounds = array<i64: 1>, scalar_prefetch = 0 : i64, scratch_operands = 0 : i64, tpu.core_type = #tpu.core_type<tc>, window_params = [{transform_indices = @transform_0, window_bounds = array<i64: 128, 32>}, {pipeline_mode = #tpu.pipeline_mode<synchronous>, transform_indices = @transform_1, window_bounds = array<i64: 32, 32>}, {pipeline_mode = #tpu.pipeline_mode<synchronous>, transform_indices = @transform_2, window_bounds = array<i64: 32, 4>}, {pipeline_mode = #tpu.pipeline_mode<synchronous>, transform_indices = @transform_3, window_bounds = array<i64: 32, 4>}, {transform_indices = @transform_4, window_bounds = array<i64: 128, 32>}, {transform_indices = @transform_5, window_bounds = array<i64: 4, 128>}, {transform_indices = @transform_6, window_bounds = array<i64: 128, 4>}]} {
    %c0 = arith.constant 0 : index
    %c0_0 = arith.constant 0 : index
    %0 = vector.load %arg1[%c0, %c0_0] : memref<128x32xbf16, #tpu.memory_space<vmem>>, vector<128x32xbf16>
    %c0_1 = arith.constant 0 : index
    %c0_2 = arith.constant 0 : index
    %1 = vector.load %arg2[%c0_1, %c0_2] : memref<32x32xbf16, #tpu.memory_space<vmem>>, vector<32x32xbf16>
    %cst = arith.constant dense<0.000000e+00> : vector<128x32xf32>
    %2 = tpu.matmul %0, %1, %cst {dimension_numbers = #tpu.dot_dimension_numbers<[1], [0], [0], [1], [0, 0, 1, 1], [], []>} : vector<128x32xbf16>, vector<32x32xbf16>, vector<128x32xf32> -> vector<128x32xf32>
    %3 = arith.truncf %2 : vector<128x32xf32> to vector<128x32xbf16>
    %c0_3 = arith.constant 0 : index
    %c0_4 = arith.constant 0 : index
    %4 = vector.load %arg5[%c0_3, %c0_4] : memref<128x32xbf16, #tpu.memory_space<vmem>>, vector<128x32xbf16>
    tpu.vector_store %arg5[%c0_3, %c0_4], %3 {strides = array<i32>} : memref<128x32xbf16, #tpu.memory_space<vmem>>, vector<128x32xbf16>,
    %c0_5 = arith.constant 0 : index
    %c0_6 = arith.constant 0 : index
    %5 = vector.load %arg3[%c0_5, %c0_6] : memref<32x4xbf16, #tpu.memory_space<vmem>>, vector<32x4xbf16>
    %cst_7 = arith.constant dense<0.000000e+00> : vector<4x128xf32>
    %6 = tpu.matmul %5, %3, %cst_7 {dimension_numbers = #tpu.dot_dimension_numbers<[0], [1], [1], [0], [0, 1, 1, 0], [], []>} : vector<32x4xbf16>, vector<128x32xbf16>, vector<4x128xf32> -> vector<4x128xf32>
    %c0_8 = arith.constant 0 : index
    %c0_9 = arith.constant 0 : index
    %7 = vector.load %arg6[%c0_8, %c0_9] : memref<4x128xf32, #tpu.memory_space<vmem>>, vector<4x128xf32>
    tpu.vector_store %arg6[%c0_8, %c0_9], %6 {strides = array<i32>} : memref<4x128xf32, #tpu.memory_space<vmem>>, vector<4x128xf32>,
    %c0_10 = arith.constant 0 : index
    %c0_11 = arith.constant 0 : index
    %8 = vector.load %arg4[%c0_10, %c0_11] : memref<32x4xbf16, #tpu.memory_space<vmem>>, vector<32x4xbf16>
    %cst_12 = arith.constant dense<0.000000e+00> : vector<128x4xf32>
    %9 = tpu.matmul %3, %8, %cst_12 {dimension_numbers = #tpu.dot_dimension_numbers<[1], [0], [0], [1], [0, 0, 1, 1], [], []>} : vector<128x32xbf16>, vector<32x4xbf16>, vector<128x4xf32> -> vector<128x4xf32>
    %c0_13 = arith.constant 0 : index
    %c0_14 = arith.constant 0 : index
    %10 = vector.load %arg7[%c0_13, %c0_14] : memref<128x4xf32, #tpu.memory_space<vmem>>, vector<128x4xf32>
    tpu.vector_store %arg7[%c0_13, %c0_14], %9 {strides = array<i32>} : memref<128x4xf32, #tpu.memory_space<vmem>>, vector<128x4xf32>,
    return
  }
  func.func @transform_0(%arg0: i32) -> (i32, i32) {
    %c0_i32 = arith.constant 0 : i32
    %c0_i32_0 = arith.constant 0 : i32
    return %arg0, %c0_i32 : i32, i32
  }
  func.func @transform_1(%arg0: i32) -> (i32, i32) {
    %c0_i32 = arith.constant 0 : i32
    %c0_i32_0 = arith.constant 0 : i32
    %c0_i32_1 = arith.constant 0 : i32
    return %c0_i32, %c0_i32_0 : i32, i32
  }
  func.func @transform_2(%arg0: i32) -> (i32, i32) {
    %c0_i32 = arith.constant 0 : i32
    %c0_i32_0 = arith.constant 0 : i32
    %c0_i32_1 = arith.constant 0 : i32
    return %c0_i32, %c0_i32_0 : i32, i32
  }
  func.func @transform_3(%arg0: i32) -> (i32, i32) {
    %c0_i32 = arith.constant 0 : i32
    %c0_i32_0 = arith.constant 0 : i32
    %c0_i32_1 = arith.constant 0 : i32
    return %c0_i32, %c0_i32_0 : i32, i32
  }
  func.func @transform_4(%arg0: i32) -> (i32, i32) {
    %c0_i32 = arith.constant 0 : i32
    %c0_i32_0 = arith.constant 0 : i32
    return %arg0, %c0_i32 : i32, i32
  }
  func.func @transform_5(%arg0: i32) -> (i32, i32) {
    %c0_i32 = arith.constant 0 : i32
    %c0_i32_0 = arith.constant 0 : i32
    return %c0_i32, %arg0 : i32, i32
  }
  func.func @transform_6(%arg0: i32) -> (i32, i32) {
    %c0_i32 = arith.constant 0 : i32
    %c0_i32_0 = arith.constant 0 : i32
    return %arg0, %c0_i32 : i32, i32
  }
}

</mosaic_0001>

<bundles_post_ra>
// kernel: tpu_custom_call.1
= control target key start
LH: loop header
LB: loop body
LE: loop exit
PB: predicated region body
PF: predicated region fallthrough
CT: control target
= control target key end

     0   :  { %vm94_vm0 = vcmask 261120   ;;  %s997_s0 = inlined_call_operand.vmem [shape: bf16[128,32], index: 0, kind: input, shape index: {}]   ;;  %s998_s1 = inlined_call_operand.vmem [shape: bf16[32,32], index: 1, kind: input, shape index: {}]   ;;  %s999_s2 = inlined_call_operand.vmem [shape: bf16[32,4], index: 2, kind: input, shape index: {}]   ;;  %s1000_s3 = inlined_call_operand.vmem [shape: bf16[32,4], index: 3, kind: input, shape index: {}]   ;;  %s1001_s4 = inlined_call_operand.vmem [shape: bf16[128,32], index: 4, kind: output, shape index: {0}]   ;;  %s1002_s5 = inlined_call_operand.hbm [shape: f32[4,128], index: 5, kind: output, shape index: {1}]   ;;  %s1003_s6 = inlined_call_operand.vmem [shape: f32[128,4], index: 6, kind: output, shape index: {2}]  }
   0x1   :  { %v705_v0 = vld [vmem:[%s998_s1] sm:$0xff]   ;;  %v706_v1 = vld [vmem:[%s998_s1 + $0x8] sm:$0xff]   ;;  %v709_v4 = vld [vmem:[%s997_s0 + $0x10] sm:$0xff]  }
   0x2   :  { %641 = vmatprep.subr.bf16.mxu0 %v705_v0  ;;  %v707_v2 = vld [vmem:[%s997_s0] sm:$0xff]   ;;  %v708_v3 = vld [vmem:[%s997_s0 + $0x8] sm:$0xff]  }
   0x3   :  { %642 = vmatpush3.bf16.msra.mxu0 %v705_v0  ;;  %645 = vmatprep.mubr.msk.bf16.mxu0 %vm94_vm0, %v707_v2  ;;  %v715_v5 = vld [vmem:[%s999_s2] sm:$0xff]   ;;  %v716_v6 = vld [vmem:[%s999_s2 + $0x8] sm:$0xff]  }
   0x4   :  { %643 = vmatprep.subr.bf16.mxu0 %v706_v1  ;;  %313 = vxpose.xlu0.c.b16.start [1/2] (short) (narrow) %v715_v5, 16  ;;  %v717_v7 = vld [vmem:[%s1000_s3] sm:$0xff]  }
   0x7   :  { %644 = vmatpush3.bf16.msra.mxu0 %v706_v1 }
   0xa   :  { %646 = vmatmul.mubr.msk.bf16.vlgmr.msra.gmra.mrb[0].mxu0 %vm94_vm0, %v708_v3 }
   0xb   :  { %649 = vmatprep.mubr.msk.bf16.mxu0 %vm94_vm0, %v709_v4 }
   0xc   :  { %12 = vsyncpa [#allocation3], 0  ;;  %v710_v8 = vld [vmem:[%s997_s0 + $0x18] sm:$0xff]   ;;  %681 = vmatprep.subr.bf16.mxu0 %v717_v7  ;;  %v711_v9 = vld [vmem:[%s997_s0 + $0x20] sm:$0xff]   ;;  %314 = vxpose.xlu0.c.b16.end [2/2] (short) (narrow) %v716_v6, 16  ;;  %v743_v14 = vmov 0.0  }
   0xd   :  { %682 = vmatpush3.bf16.msra.mxu0 %v717_v7  ;;  %v712_v10 = vld [vmem:[%s997_s0 + $0x28] sm:$0xff]   ;;  %v713_v11 = vld [vmem:[%s997_s0 + $0x30] sm:$0xff]   ;;  %v714_v12 = vld [vmem:[%s997_s0 + $0x38] sm:$0xff]   ;;  %661 = vmatprep.subr.bf16.mxu1 %v743_v14  ;;  %vm744_vm1 = vmmov 0   ;;  %vm280_vm2 = vcmask 257024   ;;  %vm510_vm3 = vcmask 31744  }
   0xe   :  { %v718_v13 = vld [vmem:[%s1000_s3 + $0x8] sm:$0xff]   ;;  %677 = vmatprep.mubr.msk.bf16.mxu1 %vm744_vm1, %v743_v14  ;;  %s745_s27 = smov [#allocation2]  }
   0xf   :  { %683 = vmatprep.subr.bf16.mxu0 %v718_v13  ;;  %s535_s28 = sshll.u32 %s745_s27, 4  ;;  %s536_s28 = int_to_ptr.vmem [resolvable:$true] %s535_s28 }
  0x10   :  { %s719_s29 = scalar_lea.vmem %s536_s28, 64  ;;  %p724_p1 = scmp.lt.s32.totalorder %s536_s28, %s536_s28 }
  0x11   :  { %684 = vmatpush3.bf16.msra.mxu0 %v718_v13  ;;  %p720_p0 = scmp.ne.s32.totalorder %s536_s28, %s719_s29  ;;  %p725_p2 = scmp.lt.s32.totalorder %s719_s29, %s719_s29 }
  0x12   :  { %650 = vmatmul.mubr.msk.bf16.gmra.mrb[4].mxu0 %vm94_vm0, %v710_v8 }
  0x13   :  { %653 = vmatprep.mubr.msk.bf16.mxu0 %vm94_vm0, %v711_v9  ;;  %p726_p3 = por %p725_p2, %p724_p1 }
  0x15   :  { %p727_p4 = pnand %p726_p3, %p720_p0 }
  0x1a   :  { %654 = vmatmul.mubr.msk.bf16.gmra.mrb[8].mxu0 %vm94_vm0, %v712_v10 }
  0x1b   :  { %657 = vmatprep.mubr.msk.bf16.mxu0 %vm94_vm0, %v713_v11 }
  0x22   :  { %658 = vmatmul.mubr.msk.bf16.gmra.mrb[12].mxu0 %vm94_vm0, %v714_v12 }
  0x6e   :  { %v321_v63 = vpop.trf.xlu0 }
  0xdd   :  { %v647_v15 = vpop.f32.mrb[0].mxu0 }
  0xde   :  { %v598_v16 = vpack.c.bf16 %v647_v15, %v647_v15  ;;  %v153_v17 = vpop.f32.mrb[1].mxu0 }
  0xdf   :  { %v596_v18 = vpack.c.bf16 %v153_v17, %v153_v17  ;;  %v648_v19 = vpop.f32.mrb[2].mxu0 }
  0xe0   :  { %283 = vst.msk [vmem:[%s1001_s4 + $0x8] sm:$0xf] %vm280_vm2, %v598_v16  ;;  %v217_v20 = vpack.c.bf16 %v648_v19, %v647_v15  ;;  %v599_v21 = vpack.c.bf16 %v648_v19, %v648_v19  ;;  %v156_v22 = vpop.f32.mrb[3].mxu0 }
  0xe1   :  { %281 = vst.msk [vmem:[%s1001_s4] sm:$0xf] %vm280_vm2, %v596_v18  ;;  %v216_v23 = vpack.c.bf16 %v156_v22, %v153_v17  ;;  %v597_v24 = vpack.c.bf16 %v156_v22, %v156_v22 }
  0xe2   :  { %284 = vst.msk [vmem:[%s1001_s4 + $0xc] sm:$0xf] %vm280_vm2, %v599_v21  ;;  %v336_v36 = vsel %vm94_vm0, %v217_v20, 0 }
  0xe3   :  { %282 = vst.msk [vmem:[%s1001_s4 + $0x4] sm:$0xf] %vm280_vm2, %v597_v24  ;;  %685 = vmatprep.mubr.msk.bf16.mxu0 %vm94_vm0, %v216_v23  ;;  %v333_v25 = vsel %vm94_vm0, %v216_v23, 0 }
  0xe4   :  { %662 = vmatpush3.bf16.xpose.msra.mxu1 %v333_v25  ;;  %686 = vmatmul.mubr.msk.bf16.vlgmr.msra.gmra.mrb[16].mxu0 %vm94_vm0, %v217_v20 }
  0xe5   :  { %v651_v26 = vpop.f32.mrb[4].mxu0  ;;  %663 = vmatprep.subr.bf16.mxu1 %v743_v14 }
  0xe6   :  { %v602_v27 = vpack.c.bf16 %v651_v26, %v651_v26  ;;  %v169_v28 = vpop.f32.mrb[5].mxu0 }
  0xe7   :  { %v600_v29 = vpack.c.bf16 %v169_v28, %v169_v28  ;;  %v652_v30 = vpop.f32.mrb[6].mxu0 }
  0xe8   :  { %287 = vst.msk [vmem:[%s1001_s4 + $0x18] sm:$0xf] %vm280_vm2, %v602_v27  ;;  %v219_v31 = vpack.c.bf16 %v652_v30, %v651_v26  ;;  %v603_v32 = vpack.c.bf16 %v652_v30, %v652_v30  ;;  %v172_v33 = vpop.f32.mrb[7].mxu0 }
  0xe9   :  { %285 = vst.msk [vmem:[%s1001_s4 + $0x10] sm:$0xf] %vm280_vm2, %v600_v29  ;;  %v218_v34 = vpack.c.bf16 %v172_v33, %v169_v28  ;;  %v601_v35 = vpack.c.bf16 %v172_v33, %v172_v33 }
  0xea   :  { %288 = vst.msk [vmem:[%s1001_s4 + $0x1c] sm:$0xf] %vm280_vm2, %v603_v32  ;;  %v342_v58 = vsel %vm94_vm0, %v219_v31, 0 }
  0xeb   :  { %286 = vst.msk [vmem:[%s1001_s4 + $0x14] sm:$0xf] %vm280_vm2, %v601_v35  ;;  %689 = vmatprep.mubr.msk.bf16.mxu0 %vm94_vm0, %v218_v34  ;;  %v339_v47 = vsel %vm94_vm0, %v218_v34, 0 }
  0xec   :  { %664 = vmatpush3.bf16.xpose.msra.mxu1 %v336_v36  ;;  %690 = vmatmul.mubr.msk.bf16.gmra.mrb[20].mxu0 %vm94_vm0, %v219_v31 }
  0xed   :  { %665 = vmatprep.subr.bf16.mxu1 %v743_v14  ;;  %v655_v37 = vpop.f32.mrb[8].mxu0 }
  0xee   :  { %v606_v38 = vpack.c.bf16 %v655_v37, %v655_v37  ;;  %v185_v39 = vpop.f32.mrb[9].mxu0 }
  0xef   :  { %v604_v40 = vpack.c.bf16 %v185_v39, %v185_v39  ;;  %v656_v41 = vpop.f32.mrb[10].mxu0 }
  0xf0   :  { %291 = vst.msk [vmem:[%s1001_s4 + $0x28] sm:$0xf] %vm280_vm2, %v606_v38  ;;  %v221_v42 = vpack.c.bf16 %v656_v41, %v655_v37  ;;  %v607_v43 = vpack.c.bf16 %v656_v41, %v656_v41  ;;  %v188_v44 = vpop.f32.mrb[11].mxu0 }
  0xf1   :  { %289 = vst.msk [vmem:[%s1001_s4 + $0x20] sm:$0xf] %vm280_vm2, %v604_v40  ;;  %v220_v45 = vpack.c.bf16 %v188_v44, %v185_v39  ;;  %v605_v46 = vpack.c.bf16 %v188_v44, %v188_v44 }
  0xf2   :  { %292 = vst.msk [vmem:[%s1001_s4 + $0x2c] sm:$0xf] %vm280_vm2, %v607_v43  ;;  %v348_v60 = vsel %vm94_vm0, %v221_v42, 0 }
  0xf3   :  { %290 = vst.msk [vmem:[%s1001_s4 + $0x24] sm:$0xf] %vm280_vm2, %v605_v46  ;;  %693 = vmatprep.mubr.msk.bf16.mxu0 %vm94_vm0, %v220_v45  ;;  %v345_v59 = vsel %vm94_vm0, %v220_v45, 0 }
  0xf4   :  { %666 = vmatpush3.bf16.xpose.msra.mxu1 %v339_v47  ;;  %694 = vmatmul.mubr.msk.bf16.gmra.mrb[24].mxu0 %vm94_vm0, %v221_v42 }
  0xf5   :  { %667 = vmatprep.subr.bf16.mxu1 %v743_v14  ;;  %v659_v48 = vpop.f32.mrb[12].mxu0 }
  0xf6   :  { %v610_v49 = vpack.c.bf16 %v659_v48, %v659_v48  ;;  %v201_v50 = vpop.f32.mrb[13].mxu0 }
  0xf7   :  { %v608_v51 = vpack.c.bf16 %v201_v50, %v201_v50  ;;  %v660_v52 = vpop.f32.mrb[14].mxu0 }
  0xf8   :  { %295 = vst.msk [vmem:[%s1001_s4 + $0x38] sm:$0xf] %vm280_vm2, %v610_v49  ;;  %v223_v53 = vpack.c.bf16 %v660_v52, %v659_v48  ;;  %v611_v54 = vpack.c.bf16 %v660_v52, %v660_v52  ;;  %v204_v55 = vpop.f32.mrb[15].mxu0 }
  0xf9   :  { %293 = vst.msk [vmem:[%s1001_s4 + $0x30] sm:$0xf] %vm280_vm2, %v608_v51  ;;  %v222_v56 = vpack.c.bf16 %v204_v55, %v201_v50  ;;  %v609_v57 = vpack.c.bf16 %v204_v55, %v204_v55 }
  0xfa   :  { %296 = vst.msk [vmem:[%s1001_s4 + $0x3c] sm:$0xf] %vm280_vm2, %v611_v54  ;;  %v354_v62 = vsel %vm94_vm0, %v223_v53, 0 }
  0xfb   :  { %294 = vst.msk [vmem:[%s1001_s4 + $0x34] sm:$0xf] %vm280_vm2, %v609_v57  ;;  %697 = vmatprep.mubr.msk.bf16.mxu0 %vm94_vm0, %v222_v56  ;;  %v351_v61 = vsel %vm94_vm0, %v222_v56, 0 }
  0xfc   :  { %668 = vmatpush3.bf16.xpose.msra.mxu1 %v342_v58  ;;  %698 = vmatmul.mubr.msk.bf16.gmra.mrb[28].mxu0 %vm94_vm0, %v223_v53 }
  0xfd   :  { %669 = vmatprep.subr.bf16.mxu1 %v743_v14 }
 0x104   :  { %670 = vmatpush3.bf16.xpose.msra.mxu1 %v345_v59 }
 0x105   :  { %671 = vmatprep.subr.bf16.mxu1 %v743_v14 }
 0x10c   :  { %672 = vmatpush3.bf16.xpose.msra.mxu1 %v348_v60 }
 0x10d   :  { %673 = vmatprep.subr.bf16.mxu1 %v743_v14 }
 0x114   :  { %674 = vmatpush3.bf16.xpose.msra.mxu1 %v351_v61 }
 0x115   :  { %675 = vmatprep.subr.bf16.mxu1 %v743_v14 }
 0x11c   :  { %676 = vmatpush3.bf16.xpose.msra.mxu1 %v354_v62 }
 0x123   :  { %678 = vmatmul.mubr.msk.bf16.vlgmr.msra.gmra.mrb[0].mxu1 %vm94_vm0, %v321_v63 }
 0x1b7   :  { %v687_v0 = vpop.f32.mrb[16].mxu0 }
 0x1b8   :  { %513 = vst.msk [vmem:[%s1003_s6 + $0x10] sm:$0xff] %vm510_vm3, %v687_v0  ;;  %v447_v1 = vpop.f32.mrb[17].mxu0 }
 0x1b9   :  { %511 = vst.msk [vmem:[%s1003_s6] sm:$0xff] %vm510_vm3, %v447_v1  ;;  %v688_v2 = vpop.f32.mrb[18].mxu0 }
 0x1ba   :  { %514 = vst.msk [vmem:[%s1003_s6 + $0x18] sm:$0xff] %vm510_vm3, %v688_v2  ;;  %v450_v3 = vpop.f32.mrb[19].mxu0 }
 0x1bb   :  { %512 = vst.msk [vmem:[%s1003_s6 + $0x8] sm:$0xff] %vm510_vm3, %v450_v3 }
 0x1bf   :  { %v691_v4 = vpop.f32.mrb[20].mxu0 }
 0x1c0   :  { %517 = vst.msk [vmem:[%s1003_s6 + $0x30] sm:$0xff] %vm510_vm3, %v691_v4  ;;  %v463_v5 = vpop.f32.mrb[21].mxu0 }
 0x1c1   :  { %515 = vst.msk [vmem:[%s1003_s6 + $0x20] sm:$0xff] %vm510_vm3, %v463_v5  ;;  %v692_v6 = vpop.f32.mrb[22].mxu0 }
 0x1c2   :  { %518 = vst.msk [vmem:[%s1003_s6 + $0x38] sm:$0xff] %vm510_vm3, %v692_v6  ;;  %v466_v7 = vpop.f32.mrb[23].mxu0 }
 0x1c3   :  { %516 = vst.msk [vmem:[%s1003_s6 + $0x28] sm:$0xff] %vm510_vm3, %v466_v7 }
 0x1c7   :  { %v695_v8 = vpop.f32.mrb[24].mxu0 }
 0x1c8   :  { %521 = vst.msk [vmem:[%s1003_s6 + $0x50] sm:$0xff] %vm510_vm3, %v695_v8  ;;  %v479_v9 = vpop.f32.mrb[25].mxu0 }
 0x1c9   :  { %519 = vst.msk [vmem:[%s1003_s6 + $0x40] sm:$0xff] %vm510_vm3, %v479_v9  ;;  %v696_v10 = vpop.f32.mrb[26].mxu0 }
 0x1ca   :  { %522 = vst.msk [vmem:[%s1003_s6 + $0x58] sm:$0xff] %vm510_vm3, %v696_v10  ;;  %v482_v11 = vpop.f32.mrb[27].mxu0 }
 0x1cb   :  { %520 = vst.msk [vmem:[%s1003_s6 + $0x48] sm:$0xff] %vm510_vm3, %v482_v11 }
 0x1cf   :  { %v699_v12 = vpop.f32.mrb[28].mxu0 }
 0x1d0   :  { %525 = vst.msk [vmem:[%s1003_s6 + $0x70] sm:$0xff] %vm510_vm3, %v699_v12  ;;  %v495_v13 = vpop.f32.mrb[29].mxu0 }
 0x1d1   :  { %523 = vst.msk [vmem:[%s1003_s6 + $0x60] sm:$0xff] %vm510_vm3, %v495_v13  ;;  %v700_v14 = vpop.f32.mrb[30].mxu0 }
 0x1d2   :  { %526 = vst.msk [vmem:[%s1003_s6 + $0x78] sm:$0xff] %vm510_vm3, %v700_v14  ;;  %v498_v15 = vpop.f32.mrb[31].mxu0 }
 0x1d3   :  { %524 = vst.msk [vmem:[%s1003_s6 + $0x68] sm:$0xff] %vm510_vm3, %v498_v15 }
 0x1f6   :  { %v390_v16 = vpop.f32.mrb[0].mxu1 }
 0x1f7   :  { %396 = vst [vmem:[#allocation2] sm:$0xf] %v390_v16  ;;  %v679_v17 = vpop.f32.mrb[1].mxu1 }
 0x1f8   :  { %v393_v18 = vpop.f32.mrb[2].mxu1 }
 0x1f9   :  { %730 = shalt.err (!%p727_p4)
}
 0x1fa   :  { %s731_s7 = scalar_lea.hbm %s1002_s5, 64 }
 0x1fb   :  { %p732_p5 = scmp.ne.s32.totalorder %s1002_s5, %s731_s7  ;;  %p735_p6 = scmp.lt.u32.totalorder %s731_s7, %s1002_s5 }
 0x1fd   :  { %p737_p7 = pnand %p735_p6, %p732_p5 }
 0x1ff   :  { %740 = shalt.err (!%p737_p7)
}
 0x200   :  { %538 = dma.vmem_to_hbm [thread:$0]  %s536_s28, 64, %s1002_s5, [#allocation3]   ;;  %v680_v19 = vpop.f32.mrb[3].mxu1 }
 0x201   :  { %741 = dma.done.wait [#allocation3], 64  }
 0x202   :  { %742 = vsyncadd [#allocation3], 4294967232 }
 0x203   :  { %548 = vsyncpa [#allocation3], 1 }

</bundles_post_ra>
